<compile_context>
chip_gen: v6e
topology: v6e:2x2x1
jax: 0.10.0
libtpu: 0.0.40
codegen_flags: <defaults>
</compile_context>

<pallas_src>
import functools

import jax
import jax.numpy as jnp
from jax import lax
from jax.experimental import pallas as pl
from jax.experimental.pallas import tpu as pltpu

LANE = 128
SUBLANE = 8


def _round_up(n, m):
    return ((n + m - 1) // m) * m


# ---------------------------------------------------------------------------
# Pallas kernel: one grid step == Tc DRQN steps (fc1->ReLU->GRU->fc2) via an
# in-kernel fori_loop.  Weights are VMEM-resident across the whole sequence;
# the hidden state is carried across chunks in a VMEM scratch.
# ---------------------------------------------------------------------------
def drqn_seq_kernel(x_ref, h0_ref, w1_ref, wx_ref, wh_ref, w2_ref, bias_ref,
                    out_ref, h_carry, *, Hp, Ap, Tc):
    c = pl.program_id(0)

    @pl.when(c == 0)
    def _():
        h_carry[...] = h0_ref[...]

    Bp = h0_ref.shape[0]
    mm_dtype = w1_ref.dtype  # f32 (default) or bf16

    # Fused bias slab: [ b1 | b_r | b_z | b_in | b_hn | b2 ] (each Hp/Ap wide).
    # Broadcasts hoisted out of the time loop (JAX does not CSE them).
    b1 = jnp.broadcast_to(bias_ref[:, 0:Hp], (Bp, Hp))
    bx = jnp.broadcast_to(bias_ref[:, Hp:4 * Hp], (Bp, 3 * Hp))   # [r|z|i_n]
    bhn = jnp.broadcast_to(bias_ref[:, 4 * Hp:5 * Hp], (Bp, Hp))  # h_n bias
    b2 = jnp.broadcast_to(bias_ref[:, 5 * Hp:], (Bp, Ap))

    # Weight loads hoisted out of the loop (VMEM-resident values).
    w1 = w1_ref[...]
    wx = wx_ref[...]
    wh = wh_ref[...]
    w2 = w2_ref[...]

    def step(t, h_prev):
        x = x_ref[t]                                              # (Bp, Dp)

        # fc1 + ReLU
        a1 = jnp.dot(x.astype(mm_dtype), w1,
                     preferred_element_type=jnp.float32) + b1
        x1 = jnp.maximum(a1, 0.0)

        # GRU gates via two split matmuls (no concat, no zero-block MXU work).
        gx = jnp.dot(x1.astype(mm_dtype), wx,
                     preferred_element_type=jnp.float32) + bx     # (Bp, 3*Hp)
        gh = jnp.dot(h_prev.astype(mm_dtype), wh,
                     preferred_element_type=jnp.float32)          # (Bp, 3*Hp)

        r = jax.nn.sigmoid(gx[:, 0:Hp] + gh[:, 0:Hp])
        z = jax.nn.sigmoid(gx[:, Hp:2 * Hp] + gh[:, Hp:2 * Hp])
        n = jnp.tanh(gx[:, 2 * Hp:] + r * (gh[:, 2 * Hp:] + bhn))
        h_new = n + z * (h_prev - n)                              # (1-z)n + z h

        # fc2
        q = jnp.dot(h_new.astype(mm_dtype), w2,
                    preferred_element_type=jnp.float32) + b2

        # Single fused, lane-dense store per step: [ h_new | q ].
        out_ref[t] = jnp.concatenate([h_new, q], axis=-1)
        return h_new

    h_final = lax.fori_loop(0, Tc, step, h_carry[...])
    h_carry[...] = h_final


# ---------------------------------------------------------------------------
# Wrapper: pads to (8, 128)-aligned shapes, chunks the time axis, and runs the
# fused sequence kernel.  Returns (q_seq (T,B,A), h_seq (T,B,H)).
# ---------------------------------------------------------------------------
def drqn_forward_sequence(x_seq, h0, packed, dims, *, time_chunk=128):
    T, B, D = x_seq.shape
    H = h0.shape[-1]
    Dp, Hp, Ap, A = dims["Dp"], dims["Hp"], dims["Ap"], dims["A"]
    Bp = _round_up(max(B, SUBLANE), SUBLANE)

    Tc = min(time_chunk, T)
    num_chunks = pl.cdiv(T, Tc)
    Tp = num_chunks * Tc

    xp = jnp.zeros((Tp, Bp, Dp), jnp.float32).at[:T, :B, :D].set(x_seq)
    hp = jnp.zeros((Bp, Hp), jnp.float32).at[:B, :H].set(h0)

    kernel = functools.partial(drqn_seq_kernel, Hp=Hp, Ap=Ap, Tc=Tc)

    out = pl.pallas_call(
        kernel,
        out_shape=jax.ShapeDtypeStruct((Tp, Bp, Hp + Ap), jnp.float32),
        grid_spec=pltpu.PrefetchScalarGridSpec(
            num_scalar_prefetch=0,
            grid=(num_chunks,),
            in_specs=[
                pl.BlockSpec((Tc, Bp, Dp), lambda c: (c, 0, 0)),   # x chunk
                pl.BlockSpec((Bp, Hp), lambda c: (0, 0)),          # h0 (resident)
                pl.BlockSpec((Dp, Hp), lambda c: (0, 0)),          # w1 (resident)
                pl.BlockSpec((Hp, 3 * Hp), lambda c: (0, 0)),      # GRU Wx
                pl.BlockSpec((Hp, 3 * Hp), lambda c: (0, 0)),      # GRU Wh
                pl.BlockSpec((Hp, Ap), lambda c: (0, 0)),          # w2 (resident)
                pl.BlockSpec((1, 5 * Hp + Ap), lambda c: (0, 0)),  # fused biases
            ],
            out_specs=pl.BlockSpec((Tc, Bp, Hp + Ap), lambda c: (c, 0, 0)),
            scratch_shapes=[pltpu.VMEM((Bp, Hp), jnp.float32)],    # h carry
        ),
        compiler_params=pltpu.CompilerParams(
            # chunk axis carries the recurrence -> must run sequentially
            dimension_semantics=("arbitrary",),
        ),
    )(xp, hp, packed["w1"], packed["wx"], packed["wh"], packed["w2"],
      packed["bias"])

    h_seq = out[:T, :B, 0:H]
    q_seq = out[:T, :B, Hp:Hp + A]
    return q_seq, h_seq


def drqn_forward_step(x, h, packed, dims):
    """Single-step forward matching the original nn.Module: (q, h_new)."""
    q_seq, h_seq = drqn_forward_sequence(x[None], h, packed, dims)
    return q_seq[0], h_seq[0]


# ---------------------------------------------------------------------------
# Parameter packing: split GRU weights per gate onto 128-lane boundaries.
# Torch-layout params (already transposed to x @ W convention):
#   w1 (D,H), b1 (H,), w_ih (H,3H), b_ih (3H,), w_hh (H,3H), b_hh (3H,),
#   w2 (H,A), b2 (A,)   -- GRU columns ordered [r, z, n].
# ---------------------------------------------------------------------------
def pack_params(p, input_dim, hidden, action_dim, matmul_dtype=jnp.float32):
    D, H, A = input_dim, hidden, action_dim
    Dp = _round_up(D, LANE)
    Hp = _round_up(H, LANE)
    Ap = _round_up(A, LANE)

    w1 = jnp.zeros((Dp, Hp), jnp.float32).at[:D, :H].set(p["w1"])
    w2 = jnp.zeros((Hp, Ap), jnp.float32).at[:H, :A].set(p["w2"])

    def pack_gates(w):  # (H, 3H) -> (Hp, 3*Hp), each gate block lane-aligned
        out = jnp.zeros((Hp, 3 * Hp), jnp.float32)
        for g in range(3):
            out = out.at[:H, g * Hp:g * Hp + H].set(w[:, g * H:(g + 1) * H])
        return out

    wx = pack_gates(p["w_ih"])   # feeds [r | z | i_n]
    wh = pack_gates(p["w_hh"])   # feeds [r | z | h_n]

    b_ih, b_hh = p["b_ih"], p["b_hh"]
    bias = jnp.zeros((1, 5 * Hp + Ap), jnp.float32)
    bias = bias.at[0, 0:H].set(p["b1"])                                      # b1
    bias = bias.at[0, Hp:Hp + H].set(b_ih[0:H] + b_hh[0:H])                  # r
    bias = bias.at[0, 2 * Hp:2 * Hp + H].set(b_ih[H:2 * H] + b_hh[H:2 * H])  # z
    bias = bias.at[0, 3 * Hp:3 * Hp + H].set(b_ih[2 * H:3 * H])              # i_n
    bias = bias.at[0, 4 * Hp:4 * Hp + H].set(b_hh[2 * H:3 * H])              # h_n
    bias = bias.at[0, 5 * Hp:5 * Hp + A].set(p["b2"])                        # b2

    packed = {
        # Pass matmul_dtype=jnp.bfloat16 on v5e/v6e/v7x for ~2-3x MXU rate and
        # half the weight VMEM (gate math and the h carry stay f32).
        "w1": w1.astype(matmul_dtype),
        "wx": wx.astype(matmul_dtype),
        "wh": wh.astype(matmul_dtype),
        "w2": w2.astype(matmul_dtype),
        "bias": bias,  # biases stay f32
    }
    dims = {"D": D, "H": H, "A": A, "Dp": Dp, "Hp": Hp, "Ap": Ap}
    return packed, dims


# ---------------------------------------------------------------------------
# Deterministic orthogonal init (emulates orthogonal_init: orthogonal weights,
# zero biases), matching nn.Linear / nn.GRUCell parameter shapes.
# ---------------------------------------------------------------------------
def orthogonal(key, shape, gain=1.0):
    rows, cols = shape
    n = max(rows, cols)
    a = jax.random.normal(key, (n, n), dtype=jnp.float32)
    q, r = jnp.linalg.qr(a)
    q = q * jnp.sign(jnp.diag(r))[None, :]
    return (gain * q[:rows, :cols]).astype(jnp.float32)


def init_params(key, input_dim, hidden, action_dim):
    k1, k2, k3, k4 = jax.random.split(key, 4)
    # PyTorch shapes: fc1.weight (H, D), rnn.weight_ih (3H, H),
    # rnn.weight_hh (3H, H), fc2.weight (A, H). Transposed to (in, out).
    return {
        "w1": orthogonal(k1, (hidden, input_dim)).T,
        "b1": jnp.zeros((hidden,), jnp.float32),
        "w_ih": orthogonal(k2, (3 * hidden, hidden)).T,
        "b_ih": jnp.zeros((3 * hidden,), jnp.float32),
        "w_hh": orthogonal(k3, (3 * hidden, hidden)).T,
        "b_hh": jnp.zeros((3 * hidden,), jnp.float32),
        "w2": orthogonal(k4, (action_dim, hidden)).T,
        "b2": jnp.zeros((action_dim,), jnp.float32),
    }


# Pure-JAX reference of the original module forward(x, h) -> (q, h_new).
def drqn_ref_step(x, h, p):
    H = h.shape[-1]
    x1 = jnp.maximum(x @ p["w1"] + p["b1"], 0.0)
    gi = x1 @ p["w_ih"] + p["b_ih"]
    gh = h @ p["w_hh"] + p["b_hh"]
    r = jax.nn.sigmoid(gi[:, :H] + gh[:, :H])
    z = jax.nn.sigmoid(gi[:, H:2 * H] + gh[:, H:2 * H])
    n = jnp.tanh(gi[:, 2 * H:] + r * gh[:, 2 * H:])
    h_new = (1.0 - z) * n + z * h
    q = h_new @ p["w2"] + p["b2"]
    return q, h_new


if __name__ == "__main__":
    batch, input_dim, hidden, action_dim, seq_len = 2, 16, 32, 4, 8

    key = jax.random.PRNGKey(0)
    kx, kh, kp = jax.random.split(key, 3)
    x_seq = jax.random.normal(kx, (seq_len, batch, input_dim), dtype=jnp.float32)
    h0 = jax.random.normal(kh, (batch, hidden), dtype=jnp.float32)
    params = init_params(kp, input_dim, hidden, action_dim)

    # f32 matmuls here for the strict tolerance; use jnp.bfloat16 on v6e/v7x.
    packed, dims = pack_params(params, input_dim, hidden, action_dim,
                               matmul_dtype=jnp.float32)

    # Fused multi-step rollout (one pallas_call, time axis chunked in-kernel).
    q_seq, h_seq = drqn_forward_sequence(x_seq, h0, packed, dims)
    q_seq = jax.block_until_ready(q_seq)
    h_seq = jax.block_until_ready(h_seq)

    # Reference: apply the original single-step module forward T times.
    h = h0
    q_ref_list, h_ref_list = [], []
    for t in range(seq_len):
        q_t, h = drqn_ref_step(x_seq[t], h, params)
        q_ref_list.append(q_t)
        h_ref_list.append(h)
    q_ref = jnp.stack(q_ref_list)
    h_ref = jnp.stack(h_ref_list)

    assert jnp.allclose(q_seq, q_ref, atol=1e-5), "q sequence mismatch vs reference"
    assert jnp.allclose(h_seq, h_ref, atol=1e-5), "h sequence mismatch vs reference"

    # Single-step path (T=1) matches the original module forward(x, h) exactly.
    q1, h1 = drqn_forward_step(x_seq[0], h0, packed, dims)
    q1 = jax.block_until_ready(q1)
    q1_ref, h1_ref = drqn_ref_step(x_seq[0], h0, params)
    assert jnp.allclose(q1, q1_ref, atol=1e-5), "single-step q mismatch"
    assert jnp.allclose(h1, h1_ref, atol=1e-5), "single-step h mismatch"

    print("KERNEL_OK")
</pallas_src>

<mosaic_0001>
module attributes {stable_mosaic.version = 11 : i64} {
  func.func @drqn_seq_kernel(%arg0: i32, %arg1: memref<8x8x128xf32, #tpu.memory_space<vmem>>, %arg2: memref<8x128xf32, #tpu.memory_space<vmem>>, %arg3: memref<128x128xf32, #tpu.memory_space<vmem>>, %arg4: memref<128x384xf32, #tpu.memory_space<vmem>>, %arg5: memref<128x384xf32, #tpu.memory_space<vmem>>, %arg6: memref<128x128xf32, #tpu.memory_space<vmem>>, %arg7: memref<1x768xf32, #tpu.memory_space<vmem>>, %arg8: memref<8x8x256xf32, #tpu.memory_space<vmem>>, %arg9: memref<8x128xf32, #tpu.memory_space<vmem>>) attributes {dimension_semantics = [#tpu.dimension_semantics<arbitrary>], iteration_bounds = array<i64: 1>, scalar_prefetch = 0 : i64, scratch_operands = 1 : i64, tpu.core_type = #tpu.core_type<tc>, window_params = [{transform_indices = @transform_0, window_bounds = array<i64: 8, 8, 128>}, {pipeline_mode = #tpu.pipeline_mode<synchronous>, transform_indices = @transform_1, window_bounds = array<i64: 8, 128>}, {pipeline_mode = #tpu.pipeline_mode<synchronous>, transform_indices = @transform_2, window_bounds = array<i64: 128, 128>}, {pipeline_mode = #tpu.pipeline_mode<synchronous>, transform_indices = @transform_3, window_bounds = array<i64: 128, 384>}, {pipeline_mode = #tpu.pipeline_mode<synchronous>, transform_indices = @transform_4, window_bounds = array<i64: 128, 384>}, {pipeline_mode = #tpu.pipeline_mode<synchronous>, transform_indices = @transform_5, window_bounds = array<i64: 128, 128>}, {pipeline_mode = #tpu.pipeline_mode<synchronous>, transform_indices = @transform_6, window_bounds = array<i64: 1, 768>}, {transform_indices = @transform_7, window_bounds = array<i64: 8, 8, 256>}]} {
    %c0_i32 = arith.constant 0 : i32
    %0 = arith.cmpi eq, %arg0, %c0_i32 : i32
    %1 = arith.extui %0 : i1 to i32
    %c0_i32_0 = arith.constant 0 : i32
    %2 = arith.cmpi ne, %1, %c0_i32_0 : i32
    scf.if %2 {
      %c0_19 = arith.constant 0 : index
      %c0_20 = arith.constant 0 : index
      %23 = vector.load %arg2[%c0_19, %c0_20] : memref<8x128xf32, #tpu.memory_space<vmem>>, vector<8x128xf32>
      %c0_21 = arith.constant 0 : index
      %c0_22 = arith.constant 0 : index
      %24 = vector.load %arg9[%c0_21, %c0_22] : memref<8x128xf32, #tpu.memory_space<vmem>>, vector<8x128xf32>
      tpu.vector_store %arg9[%c0_21, %c0_22], %23 {strides = array<i32>} : memref<8x128xf32, #tpu.memory_space<vmem>>, vector<8x128xf32>,
    } else {
    }
    %c0 = arith.constant 0 : index
    %c0_1 = arith.constant 0 : index
    %3 = vector.load %arg7[%c0, %c0_1] : memref<1x768xf32, #tpu.memory_space<vmem>>, vector<1x128xf32>
    %4 = vector.shape_cast %3 : vector<1x128xf32> to vector<1x128xf32>
    %5 = vector.broadcast %4 : vector<1x128xf32> to vector<8x128xf32>
    %c0_2 = arith.constant 0 : index
    %c128 = arith.constant 128 : index
    %6 = vector.load %arg7[%c0_2, %c128] : memref<1x768xf32, #tpu.memory_space<vmem>>, vector<1x384xf32>
    %7 = vector.shape_cast %6 : vector<1x384xf32> to vector<1x384xf32>
    %8 = vector.broadcast %7 : vector<1x384xf32> to vector<8x384xf32>
    %c0_3 = arith.constant 0 : index
    %c512 = arith.constant 512 : index
    %9 = vector.load %arg7[%c0_3, %c512] : memref<1x768xf32, #tpu.memory_space<vmem>>, vector<1x128xf32>
    %10 = vector.shape_cast %9 : vector<1x128xf32> to vector<1x128xf32>
    %11 = vector.broadcast %10 : vector<1x128xf32> to vector<8x128xf32>
    %c0_4 = arith.constant 0 : index
    %c640 = arith.constant 640 : index
    %12 = vector.load %arg7[%c0_4, %c640] : memref<1x768xf32, #tpu.memory_space<vmem>>, vector<1x128xf32>
    %13 = vector.shape_cast %12 : vector<1x128xf32> to vector<1x128xf32>
    %14 = vector.broadcast %13 : vector<1x128xf32> to vector<8x128xf32>
    %c0_5 = arith.constant 0 : index
    %c0_6 = arith.constant 0 : index
    %15 = vector.load %arg3[%c0_5, %c0_6] : memref<128x128xf32, #tpu.memory_space<vmem>>, vector<128x128xf32>
    %c0_7 = arith.constant 0 : index
    %c0_8 = arith.constant 0 : index
    %16 = vector.load %arg4[%c0_7, %c0_8] : memref<128x384xf32, #tpu.memory_space<vmem>>, vector<128x384xf32>
    %c0_9 = arith.constant 0 : index
    %c0_10 = arith.constant 0 : index
    %17 = vector.load %arg5[%c0_9, %c0_10] : memref<128x384xf32, #tpu.memory_space<vmem>>, vector<128x384xf32>
    %c0_11 = arith.constant 0 : index
    %c0_12 = arith.constant 0 : index
    %18 = vector.load %arg6[%c0_11, %c0_12] : memref<128x128xf32, #tpu.memory_space<vmem>>, vector<128x128xf32>
    %c0_13 = arith.constant 0 : index
    %c0_14 = arith.constant 0 : index
    %19 = vector.load %arg9[%c0_13, %c0_14] : memref<8x128xf32, #tpu.memory_space<vmem>>, vector<8x128xf32>
    %c0_i32_15 = arith.constant 0 : i32
    %c8_i32 = arith.constant 8 : i32
    %20 = arith.addi %c0_i32_15, %c8_i32 : i32
    %c1_i32 = arith.constant 1 : i32
    %21 = scf.for %arg10 = %c0_i32_15 to %20 step %c1_i32 iter_args(%arg11 = %19) -> (vector<8x128xf32>)  : i32 {
      %23 = arith.index_cast %arg10 : i32 to index
      %c0_19 = arith.constant 0 : index
      %c0_20 = arith.constant 0 : index
      %24 = vector.load %arg1[%23, %c0_19, %c0_20] : memref<8x8x128xf32, #tpu.memory_space<vmem>>, vector<1x8x128xf32>
      %25 = vector.shape_cast %24 : vector<1x8x128xf32> to vector<8x128xf32>
      %cst = arith.constant dense<0.000000e+00> : vector<8x128xf32>
      %26 = tpu.matmul %25, %15, %cst {dimension_numbers = #tpu.dot_dimension_numbers<[1], [0], [0], [1], [0, 0, 1, 1], [], []>} : vector<8x128xf32>, vector<128x128xf32>, vector<8x128xf32> -> vector<8x128xf32>
      %27 = arith.addf %26, %5 : vector<8x128xf32>
      %cst_21 = arith.constant 0.000000e+00 : f32
      %28 = vector.broadcast %cst_21 : f32 to vector<8x128xf32>
      %29 = arith.maximumf %27, %28 : vector<8x128xf32>
      %cst_22 = arith.constant dense<0.000000e+00> : vector<8x384xf32>
      %30 = tpu.matmul %29, %16, %cst_22 {dimension_numbers = #tpu.dot_dimension_numbers<[1], [0], [0], [1], [0, 0, 1, 1], [], []>} : vector<8x128xf32>, vector<128x384xf32>, vector<8x384xf32> -> vector<8x384xf32>
      %31 = arith.addf %30, %8 : vector<8x384xf32>
      %cst_23 = arith.constant dense<0.000000e+00> : vector<8x384xf32>
      %32 = tpu.matmul %arg11, %17, %cst_23 {dimension_numbers = #tpu.dot_dimension_numbers<[1], [0], [0], [1], [0, 0, 1, 1], [], []>} : vector<8x128xf32>, vector<128x384xf32>, vector<8x384xf32> -> vector<8x384xf32>
      %33 = vector.extract_strided_slice %31 {offsets = [0, 0], sizes = [8, 128], strides = [1, 1]} : vector<8x384xf32> to vector<8x128xf32>
      %34 = vector.extract_strided_slice %32 {offsets = [0, 0], sizes = [8, 128], strides = [1, 1]} : vector<8x384xf32> to vector<8x128xf32>
      %35 = arith.addf %33, %34 : vector<8x128xf32>
      %36 = arith.negf %35 : vector<8x128xf32>
      %37 = math.exp %36 : vector<8x128xf32>
      %cst_24 = arith.constant 1.000000e+00 : f32
      %38 = vector.broadcast %cst_24 : f32 to vector<8x128xf32>
      %39 = arith.addf %38, %37 : vector<8x128xf32>
      %40 = arith.divf %38, %39 : vector<8x128xf32>
      %41 = vector.extract_strided_slice %31 {offsets = [0, 128], sizes = [8, 128], strides = [1, 1]} : vector<8x384xf32> to vector<8x128xf32>
      %42 = vector.extract_strided_slice %32 {offsets = [0, 128], sizes = [8, 128], strides = [1, 1]} : vector<8x384xf32> to vector<8x128xf32>
      %43 = arith.addf %41, %42 : vector<8x128xf32>
      %44 = arith.negf %43 : vector<8x128xf32>
      %45 = math.exp %44 : vector<8x128xf32>
      %cst_25 = arith.constant 1.000000e+00 : f32
      %46 = vector.broadcast %cst_25 : f32 to vector<8x128xf32>
      %47 = arith.addf %46, %45 : vector<8x128xf32>
      %48 = arith.divf %46, %47 : vector<8x128xf32>
      %49 = vector.extract_strided_slice %31 {offsets = [0, 256], sizes = [8, 128], strides = [1, 1]} : vector<8x384xf32> to vector<8x128xf32>
      %50 = vector.extract_strided_slice %32 {offsets = [0, 256], sizes = [8, 128], strides = [1, 1]} : vector<8x384xf32> to vector<8x128xf32>
      %51 = arith.addf %50, %11 : vector<8x128xf32>
      %52 = arith.mulf %40, %51 : vector<8x128xf32>
      %53 = arith.addf %49, %52 : vector<8x128xf32>
      %54 = math.tanh %53 : vector<8x128xf32>
      %55 = arith.subf %arg11, %54 : vector<8x128xf32>
      %56 = arith.mulf %48, %55 : vector<8x128xf32>
      %57 = arith.addf %54, %56 : vector<8x128xf32>
      %cst_26 = arith.constant dense<0.000000e+00> : vector<8x128xf32>
      %58 = tpu.matmul %57, %18, %cst_26 {dimension_numbers = #tpu.dot_dimension_numbers<[1], [0], [0], [1], [0, 0, 1, 1], [], []>} : vector<8x128xf32>, vector<128x128xf32>, vector<8x128xf32> -> vector<8x128xf32>
      %59 = arith.addf %58, %14 : vector<8x128xf32>
      %60 = tpu.concatenate %57, %59 in 1 : vector<8x128xf32>, vector<8x128xf32> -> vector<8x256xf32>
      %61 = arith.index_cast %arg10 : i32 to index
      %c0_27 = arith.constant 0 : index
      %c0_28 = arith.constant 0 : index
      %62 = vector.load %arg8[%61, %c0_27, %c0_28] : memref<8x8x256xf32, #tpu.memory_space<vmem>>, vector<1x8x256xf32>
      %63 = vector.shape_cast %62 : vector<1x8x256xf32> to vector<8x256xf32>
      %64 = vector.shape_cast %60 : vector<8x256xf32> to vector<1x8x256xf32>
      tpu.vector_store %arg8[%61, %c0_27, %c0_28], %64 {strides = array<i32>} : memref<8x8x256xf32, #tpu.memory_space<vmem>>, vector<1x8x256xf32>,
      scf.yield %57 : vector<8x128xf32>
    }
    %c8_i32_16 = arith.constant 8 : i32
    %c0_17 = arith.constant 0 : index
    %c0_18 = arith.constant 0 : index
    %22 = vector.load %arg9[%c0_17, %c0_18] : memref<8x128xf32, #tpu.memory_space<vmem>>, vector<8x128xf32>
    tpu.vector_store %arg9[%c0_17, %c0_18], %21 {strides = array<i32>} : memref<8x128xf32, #tpu.memory_space<vmem>>, vector<8x128xf32>,
    return
  }
  func.func @transform_0(%arg0: i32) -> (i32, i32, i32) {
    %c0_i32 = arith.constant 0 : i32
    %c0_i32_0 = arith.constant 0 : i32
    %c0_i32_1 = arith.constant 0 : i32
    return %arg0, %c0_i32, %c0_i32_0 : i32, i32, i32
  }
  func.func @transform_1(%arg0: i32) -> (i32, i32) {
    %c0_i32 = arith.constant 0 : i32
    %c0_i32_0 = arith.constant 0 : i32
    %c0_i32_1 = arith.constant 0 : i32
    return %c0_i32, %c0_i32_0 : i32, i32
  }
  func.func @transform_2(%arg0: i32) -> (i32, i32) {
    %c0_i32 = arith.constant 0 : i32
    %c0_i32_0 = arith.constant 0 : i32
    %c0_i32_1 = arith.constant 0 : i32
    return %c0_i32, %c0_i32_0 : i32, i32
  }
  func.func @transform_3(%arg0: i32) -> (i32, i32) {
    %c0_i32 = arith.constant 0 : i32
    %c0_i32_0 = arith.constant 0 : i32
    %c0_i32_1 = arith.constant 0 : i32
    return %c0_i32, %c0_i32_0 : i32, i32
  }
  func.func @transform_4(%arg0: i32) -> (i32, i32) {
    %c0_i32 = arith.constant 0 : i32
    %c0_i32_0 = arith.constant 0 : i32
    %c0_i32_1 = arith.constant 0 : i32
    return %c0_i32, %c0_i32_0 : i32, i32
  }
  func.func @transform_5(%arg0: i32) -> (i32, i32) {
    %c0_i32 = arith.constant 0 : i32
    %c0_i32_0 = arith.constant 0 : i32
    %c0_i32_1 = arith.constant 0 : i32
    return %c0_i32, %c0_i32_0 : i32, i32
  }
  func.func @transform_6(%arg0: i32) -> (i32, i32) {
    %c0_i32 = arith.constant 0 : i32
    %c0_i32_0 = arith.constant 0 : i32
    %c0_i32_1 = arith.constant 0 : i32
    return %c0_i32, %c0_i32_0 : i32, i32
  }
  func.func @transform_7(%arg0: i32) -> (i32, i32, i32) {
    %c0_i32 = arith.constant 0 : i32
    %c0_i32_0 = arith.constant 0 : i32
    %c0_i32_1 = arith.constant 0 : i32
    return %arg0, %c0_i32, %c0_i32_0 : i32, i32, i32
  }
}

</mosaic_0001>

<bundles_post_ra>
// kernel: tpu_custom_call.1
= control target key start
LH: loop header
LB: loop body
LE: loop exit
PB: predicated region body
PF: predicated region fallthrough
CT: control target
= control target key end

     0   :  { %12 = vsyncpa [#allocation4], 0  ;;  %s1798_s0 = inlined_call_operand.hbm [shape: f32[8,8,128], index: 0, kind: input, shape index: {}]   ;;  %s1799_s1 = inlined_call_operand.hbm [shape: f32[8,128], index: 1, kind: input, shape index: {}]   ;;  %s1800_s2 = inlined_call_operand.hbm [shape: f32[128,128], index: 2, kind: input, shape index: {}]   ;;  %s1801_s3 = inlined_call_operand.hbm [shape: f32[128,384], index: 3, kind: input, shape index: {}]   ;;  %s1802_s4 = inlined_call_operand.hbm [shape: f32[128,384], index: 4, kind: input, shape index: {}]   ;;  %s1803_s5 = inlined_call_operand.hbm [shape: f32[128,128], index: 5, kind: input, shape index: {}]   ;;  %s1804_s6 = inlined_call_operand.vmem [shape: f32[1,768], index: 6, kind: input, shape index: {}]   ;;  %s1805_s7 = inlined_call_operand.hbm [shape: f32[8,8,256], index: 7, kind: output, shape index: {}]  }
   0x1   :  { %13 = vsyncpa [#allocation7], 0 }
   0x2   :  { %14 = vsyncpa [#allocation10], 0 }
   0x3   :  { %15 = vsyncpa [#allocation13], 0 }
   0x4   :  { %16 = vsyncpa [#allocation5], 0  ;;  %s1196_s24 = smov [#allocation6]   ;;  %s1197_s26 = smov [#allocation9]  }
   0x5   :  { %s35_s25 = sshll.u32 %s1196_s24, 4  ;;  %s56_s27 = sshll.u32 %s1197_s26, 4  ;;  %s36_s25 = int_to_ptr.vmem [resolvable:$true] %s35_s25  ;;  %s57_s27 = int_to_ptr.vmem [resolvable:$true] %s56_s27 }
   0x6   :  { %s1038_s28 = scalar_lea.vmem %s36_s25, 128  ;;  %p1043_p1 = scmp.lt.s32.totalorder %s36_s25, %s36_s25 }
   0x7   :  { %p1039_p0 = scmp.ne.s32.totalorder %s36_s25, %s1038_s28  ;;  %p1044_p2 = scmp.lt.s32.totalorder %s1038_s28, %s1038_s28 }
   0x9   :  { %p1045_p3 = por %p1044_p2, %p1043_p1 }
   0xb   :  { %p1046_p4 = pnand %p1045_p3, %p1039_p0 }
   0xd   :  { %1049 = shalt.err (!%p1046_p4)
}
   0xe   :  { %38 = dma.hbm_to_vmem [thread:$0]  %s1799_s1, 128, %s36_s25, [#allocation7]  }
   0xf   :  { %s1058_s8 = scalar_lea.vmem %s57_s27, 6144  ;;  %p1063_p6 = scmp.lt.s32.totalorder %s57_s27, %s57_s27 }
  0x10   :  { %p1059_p5 = scmp.ne.s32.totalorder %s57_s27, %s1058_s8  ;;  %p1064_p7 = scmp.lt.s32.totalorder %s1058_s8, %s1058_s8 }
  0x12   :  { %p1065_p8 = por %p1064_p7, %p1063_p6 }
  0x14   :  { %p1066_p9 = pnand %p1065_p8, %p1059_p5 }
  0x16   :  { %1069 = shalt.err (!%p1066_p9)
}
  0x17   :  { %s1198_s9 = smov 384   ;;  %s1199_s10 = smov 24  }
  0x18   :  { %62 = dma.hbm_to_vmem [thread:$0]  %s1801_s3, 6144, %s57_s27, [#allocation10], %s1198_s9, %s1198_s9, %s1199_s10  }
  0x19   :  { %s1200_s13 = smov [#allocation3]  }
  0x1a   :  { %s22_s14 = sshll.u32 %s1200_s13, 4  ;;  %s23_s14 = int_to_ptr.vmem [resolvable:$true] %s22_s14 }
  0x1b   :  { %s1078_s1 = scalar_lea.vmem %s23_s14, 1024  ;;  %p1083_p11 = scmp.lt.s32.totalorder %s23_s14, %s23_s14 }
  0x1c   :  { %p1079_p10 = scmp.ne.s32.totalorder %s23_s14, %s1078_s1  ;;  %p1084_p12 = scmp.lt.s32.totalorder %s1078_s1, %s1078_s1 }
  0x1e   :  { %p1085_p13 = por %p1084_p12, %p1083_p11 }
  0x20   :  { %p1086_p0 = pnand %p1085_p13, %p1079_p10 }
  0x22   :  { %1089 = shalt.err (!%p1086_p0)
}
  0x23   :  { %s1201_s15 = smov 128   ;;  %s1202_s16 = smov 8  }
  0x24   :  { %28 = dma.hbm_to_vmem [thread:$0]  %s1798_s0, 1024, %s23_s14, [#allocation4], %s1201_s15, %s1201_s15, %s1202_s16  }
  0x25   :  { %s1203_s3 = smov [#allocation8]   ;;  %s1204_s20 = smov [#allocation11]  }
  0x26   :  { %s44_s19 = sshll.u32 %s1203_s3, 4  ;;  %s68_s21 = sshll.u32 %s1204_s20, 4  ;;  %s45_s19 = int_to_ptr.vmem [resolvable:$true] %s44_s19  ;;  %s69_s21 = int_to_ptr.vmem [resolvable:$true] %s68_s21 }
  0x27   :  { %s1098_s22 = scalar_lea.vmem %s45_s19, 2048  ;;  %p1103_p2 = scmp.lt.s32.totalorder %s45_s19, %s45_s19 }
  0x28   :  { %p1099_p1 = scmp.ne.s32.totalorder %s45_s19, %s1098_s22  ;;  %p1104_p3 = scmp.lt.s32.totalorder %s1098_s22, %s1098_s22 }
  0x2a   :  { %p1105_p4 = por %p1104_p3, %p1103_p2 }
  0x2c   :  { %p1106_p5 = pnand %p1105_p4, %p1099_p1 }
  0x2e   :  { %1109 = shalt.err (!%p1106_p5)
}
  0x2f   :  { %50 = dma.hbm_to_vmem [thread:$0]  %s1800_s2, 2048, %s45_s19, [#allocation7], %s1201_s15, %s1201_s15, %s1202_s16  }
  0x30   :  { %s1118_s0 = scalar_lea.vmem %s69_s21, 6144  ;;  %p1123_p7 = scmp.lt.s32.totalorder %s69_s21, %s69_s21 }
  0x31   :  { %p1119_p6 = scmp.ne.s32.totalorder %s69_s21, %s1118_s0  ;;  %p1124_p8 = scmp.lt.s32.totalorder %s1118_s0, %s1118_s0 }
  0x33   :  { %p1125_p9 = por %p1124_p8, %p1123_p7 }
  0x35   :  { %p1126_p10 = pnand %p1125_p9, %p1119_p6 }
  0x37   :  { %1129 = shalt.err (!%p1126_p10)
}
  0x38   :  { %74 = dma.hbm_to_vmem [thread:$0]  %s1802_s4, 6144, %s69_s21, [#allocation10], %s1198_s9, %s1198_s9, %s1199_s10  }
  0x39   :  { %s1205_s27 = smov [#allocation12]  }
  0x3a   :  { %s80_s28 = sshll.u32 %s1205_s27, 4  ;;  %s81_s28 = int_to_ptr.vmem [resolvable:$true] %s80_s28 }
  0x3b   :  { %s1138_s29 = scalar_lea.vmem %s81_s28, 2048  ;;  %p1143_p12 = scmp.lt.s32.totalorder %s81_s28, %s81_s28 }
  0x3c   :  { %p1139_p11 = scmp.ne.s32.totalorder %s81_s28, %s1138_s29  ;;  %p1144_p13 = scmp.lt.s32.totalorder %s1138_s29, %s1138_s29 }
  0x3e   :  { %p1145_p0 = por %p1144_p13, %p1143_p12 }
  0x40   :  { %p1146_p1 = pnand %p1145_p0, %p1139_p11 }
  0x42   :  { %1149 = shalt.err (!%p1146_p1)
}
  0x43   :  { %86 = dma.hbm_to_vmem [thread:$0]  %s1803_s5, 2048, %s81_s28, [#allocation13], %s1201_s15, %s1201_s15, %s1202_s16  }
  0x44   :  { %1178 = dma.done.wait [#allocation4], 1024  }
  0x45   :  { %1179 = vsyncadd [#allocation4], 4294966272 }
  0x46   :  { %1180 = dma.done.wait [#allocation7], 2176  }
  0x47   :  { %1181 = vsyncadd [#allocation7], 4294965120 }
  0x48   :  { %1182 = dma.done.wait [#allocation10], 12288  }
  0x49   :  { %1183 = vsyncadd [#allocation10], 4294955008 }
  0x4a   :  { %1184 = dma.done.wait [#allocation13], 2048  }
  0x4b   :  { %1185 = vsyncadd [#allocation13], 4294965248  ;;  %v122_v0 = vlaneseq  ;;  %v1284_v5 = vld [vmem:[#allocation6] sm:$0xff]   ;;  %v1310_v13 = vld [vmem:[#allocation8] sm:$0xff] }
  0x4c   :  { %v1289_v6 = vld [vmem:[%s1804_s6] ss:$0 sm:$0xff]  ;;  %v120_v7 = vld [vmem:[%s1804_s6 + $0x1] sm:$0x7]  ;;  %v1303_v11 = vld [vmem:[%s1804_s6 + $0x4] ss:$0 sm:$0xff] }
  0x4d   :  { %v123_v1 = vshrl.u32 %v122_v0, 7  ;;  %1806 = vst [vmem:[#allocation20_spill] sm:$0xff] %v1289_v6  ;;  %1810 = vst [vmem:[#allocation24_spill] sm:$0xff] %v1303_v11  ;;  %v1308_v12 = vld [vmem:[%s1804_s6 + $0x5] ss:$0 sm:$0xff]  ;;  %v1312_v14 = vld [vmem:[#allocation8 + $0x8] sm:$0xff] }
  0x4e   :  { %1811 = vst [vmem:[#allocation25_spill] sm:$0xff] %v1308_v12  ;;  %1812 = vst [vmem:[#allocation26_spill] sm:$0xff] %v1310_v13  ;;  %v1314_v15 = vld [vmem:[#allocation8 + $0x10] sm:$0xff]  ;;  %v1316_v16 = vld [vmem:[#allocation8 + $0x18] sm:$0xff]  ;;  %s1569_s6 = smov 0  }
  0x4f   :  { %v124_v2 = vsub.s32 0, %v123_v1  ;;  %v128_v3 = vsub.s32 1, %v123_v1  ;;  %v132_v4 = vsub.s32 2, %v123_v1  ;;  %1813 = vst [vmem:[#allocation27_spill] sm:$0xff] %v1312_v14  ;;  %1814 = vst [vmem:[#allocation28_spill] sm:$0xff] %v1314_v15  ;;  %v1318_v17 = vld [vmem:[#allocation8 + $0x20] sm:$0xff] }
  0x50   :  { %1815 = vst [vmem:[#allocation29_spill] sm:$0xff] %v1316_v16  ;;  %1816 = vst [vmem:[#allocation30_spill] sm:$0xff] %v1318_v17  ;;  %v1320_v18 = vld [vmem:[#allocation8 + $0x28] sm:$0xff]  ;;  %v1322_v19 = vld [vmem:[#allocation8 + $0x30] sm:$0xff] }
  0x51   :  { %v1294_v8 = vrot.slane %v120_v7, %v124_v2  ;;  %v1296_v9 = vrot.slane %v120_v7, %v128_v3  ;;  %v1298_v10 = vrot.slane %v120_v7, %v132_v4  ;;  %1817 = vst [vmem:[#allocation31_spill] sm:$0xff] %v1320_v18  ;;  %1818 = vst [vmem:[#allocation32_spill] sm:$0xff] %v1322_v19  ;;  %v1324_v20 = vld [vmem:[#allocation8 + $0x38] sm:$0xff]  ;;  %v1326_v21 = vld [vmem:[#allocation8 + $0x40] sm:$0xff] }
  0x52   :  { %v1328_v22 = vld [vmem:[#allocation8 + $0x48] sm:$0xff]  ;;  %v1330_v23 = vld [vmem:[#allocation8 + $0x50] sm:$0xff]  ;;  %v1332_v24 = vld [vmem:[#allocation8 + $0x58] sm:$0xff] }
  0x53   :  { %1807 = vst [vmem:[#allocation21_spill] sm:$0xff] %v1294_v8  ;;  %1808 = vst [vmem:[#allocation22_spill] sm:$0xff] %v1296_v9  ;;  %v1334_v25 = vld [vmem:[#allocation8 + $0x60] sm:$0xff]  ;;  %v1336_v26 = vld [vmem:[#allocation8 + $0x68] sm:$0xff] }
  0x54   :  { %1809 = vst [vmem:[#allocation23_spill] sm:$0xff] %v1298_v10  ;;  %v1338_v27 = vld [vmem:[#allocation8 + $0x70] sm:$0xff]  ;;  %v1340_v28 = vld [vmem:[#allocation8 + $0x78] sm:$0xff]  ;;  %v1342_v29 = vld [vmem:[#allocation9] sm:$0xff] }
  0x55   :  { %v1344_v30 = vld [vmem:[#allocation9 + $0x8] sm:$0xff]  ;;  %v1346_v31 = vld [vmem:[#allocation9 + $0x10] sm:$0xff]  ;;  %v1348_v32 = vld [vmem:[#allocation9 + $0x18] sm:$0xff] }
  0x56   :  { %1819 = vst [vmem:[#allocation33_spill] sm:$0xff] %v1346_v31  ;;  %v1350_v33 = vld [vmem:[#allocation9 + $0x20] sm:$0xff]  ;;  %v1352_v34 = vld [vmem:[#allocation9 + $0x28] sm:$0xff]  ;;  %v1354_v35 = vld [vmem:[#allocation9 + $0x30] sm:$0xff] }
  0x57   :  { %1820 = vst [vmem:[#allocation34_spill] sm:$0xff] %v1352_v34  ;;  %v1356_v36 = vld [vmem:[#allocation9 + $0x38] sm:$0xff]  ;;  %v1358_v37 = vld [vmem:[#allocation9 + $0x40] sm:$0xff]  ;;  %v1360_v38 = vld [vmem:[#allocation9 + $0x48] sm:$0xff] }
  0x58   :  { %1821 = vst [vmem:[#allocation35_spill] sm:$0xff] %v1358_v37  ;;  %v1362_v39 = vld [vmem:[#allocation9 + $0x50] sm:$0xff]  ;;  %v1364_v40 = vld [vmem:[#allocation9 + $0x58] sm:$0xff]  ;;  %v1366_v41 = vld [vmem:[#allocation9 + $0x60] sm:$0xff] }
  0x59   :  { %1822 = vst [vmem:[#allocation36_spill] sm:$0xff] %v1364_v40  ;;  %v1368_v42 = vld [vmem:[#allocation9 + $0x68] sm:$0xff]  ;;  %v1370_v43 = vld [vmem:[#allocation9 + $0x70] sm:$0xff]  ;;  %v1372_v44 = vld [vmem:[#allocation9 + $0x78] sm:$0xff] }
  0x5a   :  { %1823 = vst [vmem:[#allocation37_spill] sm:$0xff] %v1370_v43  ;;  %v1374_v45 = vld [vmem:[#allocation9 + $0x80] sm:$0xff]  ;;  %v1376_v46 = vld [vmem:[#allocation9 + $0x88] sm:$0xff]  ;;  %v1378_v47 = vld [vmem:[#allocation9 + $0x90] sm:$0xff] }
  0x5b   :  { %1824 = vst [vmem:[#allocation38_spill] sm:$0xff] %v1376_v46  ;;  %v1380_v48 = vld [vmem:[#allocation9 + $0x98] sm:$0xff]  ;;  %v1382_v49 = vld [vmem:[#allocation9 + $0xa0] sm:$0xff]  ;;  %v1384_v50 = vld [vmem:[#allocation9 + $0xa8] sm:$0xff] }
  0x5c   :  { %1825 = vst [vmem:[#allocation39_spill] sm:$0xff] %v1382_v49  ;;  %v1386_v51 = vld [vmem:[#allocation9 + $0xb0] sm:$0xff]  ;;  %v1388_v52 = vld [vmem:[#allocation9 + $0xb8] sm:$0xff]  ;;  %v1390_v53 = vld [vmem:[#allocation9 + $0xc0] sm:$0xff] }
  0x5d   :  { %1826 = vst [vmem:[#allocation40_spill] sm:$0xff] %v1388_v52  ;;  %v1392_v54 = vld [vmem:[#allocation9 + $0xc8] sm:$0xff]  ;;  %v1394_v55 = vld [vmem:[#allocation9 + $0xd0] sm:$0xff]  ;;  %v1396_v56 = vld [vmem:[#allocation9 + $0xd8] sm:$0xff] }
  0x5e   :  { %1827 = vst [vmem:[#allocation41_spill] sm:$0xff] %v1394_v55  ;;  %v1398_v57 = vld [vmem:[#allocation9 + $0xe0] sm:$0xff]  ;;  %v1400_v58 = vld [vmem:[#allocation9 + $0xe8] sm:$0xff]  ;;  %v1402_v59 = vld [vmem:[#allocation9 + $0xf0] sm:$0xff] }
  0x5f   :  { %1828 = vst [vmem:[#allocation42_spill] sm:$0xff] %v1400_v58  ;;  %v1404_v60 = vld [vmem:[#allocation9 + $0xf8] sm:$0xff]  ;;  %v1406_v61 = vld [vmem:[#allocation9 + $0x100] sm:$0xff]  ;;  %v1408_v62 = vld [vmem:[#allocation9 + $0x108] sm:$0xff] }
  0x60   :  { %1829 = vst [vmem:[#allocation43_spill] sm:$0xff] %v1406_v61  ;;  %v1410_v63 = vld [vmem:[#allocation9 + $0x110] sm:$0xff]  ;;  %v1412_v0 = vld [vmem:[#allocation9 + $0x118] sm:$0xff]  ;;  %v1414_v1 = vld [vmem:[#allocation9 + $0x120] sm:$0xff] }
  0x61   :  { %1830 = vst [vmem:[#allocation44_spill] sm:$0xff] %v1412_v0  ;;  %1831 = vst [vmem:[#allocation45_spill] sm:$0xff] %v1414_v1  ;;  %v1416_v2 = vld [vmem:[#allocation9 + $0x128] sm:$0xff]  ;;  %v1418_v3 = vld [vmem:[#allocation9 + $0x130] sm:$0xff] }
  0x62   :  { %1832 = vst [vmem:[#allocation46_spill] sm:$0xff] %v1416_v2  ;;  %1833 = vst [vmem:[#allocation47_spill] sm:$0xff] %v1418_v3  ;;  %v1420_v4 = vld [vmem:[#allocation9 + $0x138] sm:$0xff]  ;;  %v1422_v7 = vld [vmem:[#allocation9 + $0x140] sm:$0xff] }
  0x63   :  { %1834 = vst [vmem:[#allocation48_spill] sm:$0xff] %v1420_v4  ;;  %1835 = vst [vmem:[#allocation49_spill] sm:$0xff] %v1422_v7  ;;  %v1424_v12 = vld [vmem:[#allocation9 + $0x148] sm:$0xff]  ;;  %v1426_v10 = vld [vmem:[#allocation9 + $0x150] sm:$0xff] }
  0x64   :  { %1836 = vst [vmem:[#allocation50_spill] sm:$0xff] %v1424_v12  ;;  %1837 = vst [vmem:[#allocation51_spill] sm:$0xff] %v1426_v10  ;;  %v1428_v11 = vld [vmem:[#allocation9 + $0x158] sm:$0xff]  ;;  %v1430_v9 = vld [vmem:[#allocation9 + $0x160] sm:$0xff] }
  0x65   :  { %1838 = vst [vmem:[#allocation52_spill] sm:$0xff] %v1428_v11  ;;  %1839 = vst [vmem:[#allocation53_spill] sm:$0xff] %v1430_v9  ;;  %v1432_v8 = vld [vmem:[#allocation9 + $0x168] sm:$0xff]  ;;  %v1434_v6 = vld [vmem:[#allocation9 + $0x170] sm:$0xff] }
  0x66   :  { %1840 = vst [vmem:[#allocation54_spill] sm:$0xff] %v1432_v8  ;;  %1841 = vst [vmem:[#allocation55_spill] sm:$0xff] %v1434_v6  ;;  %v1436_v31 = vld [vmem:[#allocation9 + $0x178] sm:$0xff]  ;;  %v1438_v34 = vld [vmem:[#allocation11] sm:$0xff] }
  0x67   :  { %1842 = vst [vmem:[#allocation56_spill] sm:$0xff] %v1438_v34  ;;  %v1440_v37 = vld [vmem:[#allocation11 + $0x8] sm:$0xff]  ;;  %v1442_v40 = vld [vmem:[#allocation11 + $0x10] sm:$0xff]  ;;  %v1444_v43 = vld [vmem:[#allocation11 + $0x18] sm:$0xff] }
  0x68   :  { %1843 = vst [vmem:[#allocation57_spill] sm:$0xff] %v1440_v37  ;;  %1844 = vst [vmem:[#allocation58_spill] sm:$0xff] %v1442_v40  ;;  %v1446_v46 = vld [vmem:[#allocation11 + $0x20] sm:$0xff]  ;;  %v1448_v49 = vld [vmem:[#allocation11 + $0x28] sm:$0xff] }
  0x69   :  { %1845 = vst [vmem:[#allocation59_spill] sm:$0xff] %v1444_v43  ;;  %1846 = vst [vmem:[#allocation60_spill] sm:$0xff] %v1446_v46  ;;  %v1450_v52 = vld [vmem:[#allocation11 + $0x30] sm:$0xff]  ;;  %v1452_v55 = vld [vmem:[#allocation11 + $0x38] sm:$0xff] }
  0x6a   :  { %1847 = vst [vmem:[#allocation61_spill] sm:$0xff] %v1448_v49  ;;  %1848 = vst [vmem:[#allocation62_spill] sm:$0xff] %v1450_v52  ;;  %v1454_v58 = vld [vmem:[#allocation11 + $0x40] sm:$0xff]  ;;  %v1456_v61 = vld [vmem:[#allocation11 + $0x48] sm:$0xff] }
  0x6b   :  { %1849 = vst [vmem:[#allocation63_spill] sm:$0xff] %v1452_v55  ;;  %1850 = vst [vmem:[#allocation64_spill] sm:$0xff] %v1454_v58  ;;  %v1458_v0 = vld [vmem:[#allocation11 + $0x50] sm:$0xff]  ;;  %v1460_v34 = vld [vmem:[#allocation11 + $0x58] sm:$0xff] }
  0x6c   :  { %1851 = vst [vmem:[#allocation65_spill] sm:$0xff] %v1456_v61  ;;  %1852 = vst [vmem:[#allocation66_spill] sm:$0xff] %v1458_v0  ;;  %v1462_v37 = vld [vmem:[#allocation11 + $0x60] sm:$0xff]  ;;  %v1464_v40 = vld [vmem:[#allocation11 + $0x68] sm:$0xff] }
  0x6d   :  { %1853 = vst [vmem:[#allocation67_spill] sm:$0xff] %v1460_v34  ;;  %1854 = vst [vmem:[#allocation68_spill] sm:$0xff] %v1462_v37  ;;  %v1466_v43 = vld [vmem:[#allocation11 + $0x70] sm:$0xff]  ;;  %v1468_v46 = vld [vmem:[#allocation11 + $0x78] sm:$0xff] }
  0x6e   :  { %1855 = vst [vmem:[#allocation69_spill] sm:$0xff] %v1464_v40  ;;  %1856 = vst [vmem:[#allocation70_spill] sm:$0xff] %v1466_v43  ;;  %v1470_v49 = vld [vmem:[#allocation11 + $0x80] sm:$0xff]  ;;  %v1472_v52 = vld [vmem:[#allocation11 + $0x88] sm:$0xff] }
  0x6f   :  { %1857 = vst [vmem:[#allocation71_spill] sm:$0xff] %v1468_v46  ;;  %1858 = vst [vmem:[#allocation72_spill] sm:$0xff] %v1470_v49  ;;  %v1474_v55 = vld [vmem:[#allocation11 + $0x90] sm:$0xff]  ;;  %v1476_v58 = vld [vmem:[#allocation11 + $0x98] sm:$0xff] }
  0x70   :  { %1859 = vst [vmem:[#allocation73_spill] sm:$0xff] %v1472_v52  ;;  %1860 = vst [vmem:[#allocation74_spill] sm:$0xff] %v1474_v55  ;;  %v1478_v61 = vld [vmem:[#allocation11 + $0xa0] sm:$0xff]  ;;  %v1480_v0 = vld [vmem:[#allocation11 + $0xa8] sm:$0xff] }
  0x71   :  { %1861 = vst [vmem:[#allocation75_spill] sm:$0xff] %v1476_v58  ;;  %1862 = vst [vmem:[#allocation76_spill] sm:$0xff] %v1478_v61  ;;  %v1482_v34 = vld [vmem:[#allocation11 + $0xb0] sm:$0xff]  ;;  %v1484_v37 = vld [vmem:[#allocation11 + $0xb8] sm:$0xff] }
  0x72   :  { %1863 = vst [vmem:[#allocation77_spill] sm:$0xff] %v1480_v0  ;;  %1864 = vst [vmem:[#allocation78_spill] sm:$0xff] %v1482_v34  ;;  %v1486_v40 = vld [vmem:[#allocation11 + $0xc0] sm:$0xff]  ;;  %v1488_v43 = vld [vmem:[#allocation11 + $0xc8] sm:$0xff] }
  0x73   :  { %1865 = vst [vmem:[#allocation79_spill] sm:$0xff] %v1484_v37  ;;  %1866 = vst [vmem:[#allocation80_spill] sm:$0xff] %v1486_v40  ;;  %v1490_v46 = vld [vmem:[#allocation11 + $0xd0] sm:$0xff]  ;;  %v1492_v49 = vld [vmem:[#allocation11 + $0xd8] sm:$0xff] }
  0x74   :  { %1867 = vst [vmem:[#allocation81_spill] sm:$0xff] %v1488_v43  ;;  %1868 = vst [vmem:[#allocation82_spill] sm:$0xff] %v1490_v46  ;;  %v1494_v52 = vld [vmem:[#allocation11 + $0xe0] sm:$0xff]  ;;  %v1496_v55 = vld [vmem:[#allocation11 + $0xe8] sm:$0xff] }
  0x75   :  { %1869 = vst [vmem:[#allocation83_spill] sm:$0xff] %v1492_v49  ;;  %1870 = vst [vmem:[#allocation84_spill] sm:$0xff] %v1494_v52  ;;  %v1498_v58 = vld [vmem:[#allocation11 + $0xf0] sm:$0xff]  ;;  %v1500_v61 = vld [vmem:[#allocation11 + $0xf8] sm:$0xff] }
  0x76   :  { %1871 = vst [vmem:[#allocation85_spill] sm:$0xff] %v1496_v55  ;;  %1872 = vst [vmem:[#allocation86_spill] sm:$0xff] %v1498_v58  ;;  %v1502_v0 = vld [vmem:[#allocation11 + $0x100] sm:$0xff]  ;;  %v1504_v34 = vld [vmem:[#allocation11 + $0x108] sm:$0xff] }
  0x77   :  { %1873 = vst [vmem:[#allocation87_spill] sm:$0xff] %v1500_v61  ;;  %1874 = vst [vmem:[#allocation88_spill] sm:$0xff] %v1502_v0  ;;  %v1506_v37 = vld [vmem:[#allocation11 + $0x110] sm:$0xff]  ;;  %v1508_v40 = vld [vmem:[#allocation11 + $0x118] sm:$0xff] }
  0x78   :  { %1875 = vst [vmem:[#allocation89_spill] sm:$0xff] %v1504_v34  ;;  %1876 = vst [vmem:[#allocation90_spill] sm:$0xff] %v1506_v37  ;;  %v1510_v43 = vld [vmem:[#allocation11 + $0x120] sm:$0xff]  ;;  %v1512_v46 = vld [vmem:[#allocation11 + $0x128] sm:$0xff] }
  0x79   :  { %1877 = vst [vmem:[#allocation91_spill] sm:$0xff] %v1508_v40  ;;  %1878 = vst [vmem:[#allocation92_spill] sm:$0xff] %v1510_v43  ;;  %v1514_v49 = vld [vmem:[#allocation11 + $0x130] sm:$0xff]  ;;  %v1516_v52 = vld [vmem:[#allocation11 + $0x138] sm:$0xff] }
  0x7a   :  { %1879 = vst [vmem:[#allocation93_spill] sm:$0xff] %v1512_v46  ;;  %1880 = vst [vmem:[#allocation94_spill] sm:$0xff] %v1514_v49  ;;  %v1518_v55 = vld [vmem:[#allocation11 + $0x140] sm:$0xff]  ;;  %v1520_v58 = vld [vmem:[#allocation11 + $0x148] sm:$0xff] }
  0x7b   :  { %1881 = vst [vmem:[#allocation95_spill] sm:$0xff] %v1516_v52  ;;  %1882 = vst [vmem:[#allocation96_spill] sm:$0xff] %v1518_v55  ;;  %v1522_v61 = vld [vmem:[#allocation11 + $0x150] sm:$0xff]  ;;  %v1524_v0 = vld [vmem:[#allocation11 + $0x158] sm:$0xff] }
  0x7c   :  { %1883 = vst [vmem:[#allocation97_spill] sm:$0xff] %v1520_v58  ;;  %1884 = vst [vmem:[#allocation98_spill] sm:$0xff] %v1522_v61  ;;  %v1526_v34 = vld [vmem:[#allocation11 + $0x160] sm:$0xff]  ;;  %v1528_v37 = vld [vmem:[#allocation11 + $0x168] sm:$0xff] }
  0x7d   :  { %1885 = vst [vmem:[#allocation99_spill] sm:$0xff] %v1524_v0  ;;  %1886 = vst [vmem:[#allocation100_spill] sm:$0xff] %v1526_v34  ;;  %v1530_v40 = vld [vmem:[#allocation11 + $0x170] sm:$0xff]  ;;  %v1532_v43 = vld [vmem:[#allocation11 + $0x178] sm:$0xff] }
  0x7e   :  { %1887 = vst [vmem:[#allocation101_spill] sm:$0xff] %v1528_v37  ;;  %1888 = vst [vmem:[#allocation102_spill] sm:$0xff] %v1532_v43  ;;  %v1534_v46 = vld [vmem:[#allocation12] sm:$0xff]  ;;  %v1536_v49 = vld [vmem:[#allocation12 + $0x8] sm:$0xff] }
  0x7f   :  { %1889 = vst [vmem:[#allocation103_spill] sm:$0xff] %v1534_v46  ;;  %1890 = vst [vmem:[#allocation104_spill] sm:$0xff] %v1536_v49  ;;  %v1538_v52 = vld [vmem:[#allocation12 + $0x10] sm:$0xff]  ;;  %v1540_v55 = vld [vmem:[#allocation12 + $0x18] sm:$0xff] }
  0x80   :  { %1891 = vst [vmem:[#allocation105_spill] sm:$0xff] %v1538_v52  ;;  %1892 = vst [vmem:[#allocation106_spill] sm:$0xff] %v1540_v55  ;;  %v1542_v58 = vld [vmem:[#allocation12 + $0x20] sm:$0xff]  ;;  %v1544_v61 = vld [vmem:[#allocation12 + $0x28] sm:$0xff] }
  0x81   :  { %1893 = vst [vmem:[#allocation107_spill] sm:$0xff] %v1542_v58  ;;  %1894 = vst [vmem:[#allocation108_spill] sm:$0xff] %v1544_v61  ;;  %v1546_v0 = vld [vmem:[#allocation12 + $0x30] sm:$0xff]  ;;  %v1548_v34 = vld [vmem:[#allocation12 + $0x38] sm:$0xff] }
  0x82   :  { %1895 = vst [vmem:[#allocation109_spill] sm:$0xff] %v1546_v0  ;;  %v1550_v37 = vld [vmem:[#allocation12 + $0x40] sm:$0xff]  ;;  %v1552_v3 = vld [vmem:[#allocation12 + $0x48] sm:$0xff]  ;;  %v1554_v43 = vld [vmem:[#allocation12 + $0x50] sm:$0xff] }
  0x83   :  { %1896 = vst [vmem:[#allocation110_spill] sm:$0xff] %v1552_v3  ;;  %v1556_v46 = vld [vmem:[#allocation12 + $0x58] sm:$0xff]  ;;  %v1558_v49 = vld [vmem:[#allocation12 + $0x60] sm:$0xff]  ;;  %v1560_v52 = vld [vmem:[#allocation12 + $0x68] sm:$0xff] }
  0x84   :  { %v1562_v55 = vld [vmem:[#allocation12 + $0x70] sm:$0xff]  ;;  %v1564_v58 = vld [vmem:[#allocation12 + $0x78] sm:$0xff] }
  0x85 LB: > { %v1897_v6 = vld [vmem:[#allocation55_spill] sm:$0xff]  ;;  %v1206_v61 = vmov 0.0   ;;  %vm1207_vm0 = vmmov 0   ;;  %v1898_v8 = vld [vmem:[#allocation54_spill] sm:$0xff]  ;;  %v1899_v11 = vld [vmem:[#allocation52_spill] sm:$0xff]  ;;  %s775_s14 = sshll.u32 %s1194_s6, 3  ;;  %s1194_s6 = sphi %s1569_s6, %s285_s6   ;;  %v1190_v5 = vphi %v1284_v5, %v663_v5  }
  0x86   : > { %361 = vmatprep.subr.mxu1 %v1897_v6  ;;  %849 = vmatprep.subr.mxu0 %v1206_v61  ;;  %v1900_v10 = vld [vmem:[#allocation51_spill] sm:$0xff]  ;;  %v1901_v7 = vld [vmem:[#allocation49_spill] sm:$0xff]  ;;  %v1902_v4 = vld [vmem:[#allocation48_spill] sm:$0xff]  ;;  %s288_s1 = scalar_lea.vmem [#allocation3], %s775_s14  ;;  %s780_s15 = sshll.u32 %s1194_s6, 4 }
  0x87   : > { %881 = vmatprep.mubr.msk.f32.mxu0 %vm1207_vm0, %v1206_v61  ;;  %850 = vmatpush3.msra.mxu0 %v1340_v28  ;;  %v1903_v2 = vld [vmem:[#allocation46_spill] sm:$0xff]  ;;  %v1904_v1 = vld [vmem:[#allocation45_spill] sm:$0xff]  ;;  %v1905_v19 = vld [vmem:[#allocation32_spill] sm:$0xff]  ;;  %s736_s16 = scalar_lea.vmem [#allocation14], %s780_s15  ;;  %s285_s6 = sadd.s32 1, %s1194_s6  }
  0x88   : > { %362 = vmatpush1.msra.mxu1 %v1898_v8  ;;  %851 = vmatprep.subr.mxu0 %v1206_v61  ;;  %v1906_v18 = vld [vmem:[#allocation31_spill] sm:$0xff]  ;;  %v1907_v17 = vld [vmem:[#allocation30_spill] sm:$0xff]  ;;  %v1908_v16 = vld [vmem:[#allocation29_spill] sm:$0xff]  ;;  %p282_p2 = scmp.ge.s32.totalorder %s285_s6, 8  }
  0x89   : > { %363 = vmatprep.subr.mxu1 %v1899_v11  ;;  %852 = vmatpush3.msra.mxu0 %v1338_v27  ;;  %v1909_v15 = vld [vmem:[#allocation28_spill] sm:$0xff]  ;;  %v1910_v14 = vld [vmem:[#allocation27_spill] sm:$0xff]  ;;  %v1911_v13 = vld [vmem:[#allocation26_spill] sm:$0xff]  ;;  %s1208_s17 = smov (%p282_p2), [#allocation14]  }
  0x8a   : > { %364 = vmatpush1.msra.mxu1 %v1900_v10  ;;  %853 = vmatprep.subr.mxu0 %v1206_v61  ;;  %v1912_v9 = vld [vmem:[#allocation53_spill] sm:$0xff]  ;;  %v1913_v12 = vld [vmem:[#allocation50_spill] sm:$0xff]  ;;  %v1919_v8 = vld [vmem:[#allocation40_spill] sm:$0xff]  ;;  %s745_s18 = sshll.u32 (%p282_p2), %s1208_s17, 4  ;;  %s746_s18 = int_to_ptr.vmem [resolvable:$true] %s745_s18 }
  0x8b   : > { %365 = vmatprep.subr.mxu1 %v1901_v7  ;;  %854 = vmatpush3.msra.mxu0 %v1336_v26  ;;  %v1917_v6 = vld [vmem:[#allocation42_spill] sm:$0xff]  ;;  %v1918_v7 = vld [vmem:[#allocation41_spill] sm:$0xff]  ;;  %s1150_s3 = scalar_lea.vmem (%p282_p2), %s746_s18, 2048  ;;  %p1155_p4 = scmp.lt.s32.totalorder (%p282_p2), %s746_s18, %s746_s18 }
  0x8c   : > { %366 = vmatpush1.msra.mxu1 %v1902_v4  ;;  %855 = vmatprep.subr.mxu0 %v1206_v61  ;;  %v1916_v4 = vld [vmem:[#allocation43_spill] sm:$0xff]  ;;  %v1975_v3 = vld [vmem:[#allocation110_spill] sm:$0xff]  ;;  %v1976_v0 = vld [vmem:[#allocation109_spill] sm:$0xff]  ;;  %p1151_p3 = scmp.ne.s32.totalorder (%p282_p2), %s746_s18, %s1150_s3  ;;  %p1156_p5 = scmp.lt.s32.totalorder (%p282_p2), %s1150_s3, %s1150_s3 }
  0x8d   : > { %367 = vmatprep.subr.mxu1 %v1903_v2  ;;  %856 = vmatpush3.msra.mxu0 %v1334_v25  ;;  %v1915_v2 = vld [vmem:[#allocation44_spill] sm:$0xff] }
  0x8e   : > { %368 = vmatpush1.msra.mxu1 %v1904_v1  ;;  %857 = vmatprep.subr.mxu0 %v1206_v61  ;;  %v289_v1 = vld [vmem:[%s288_s1] sm:$0xff]  ;;  %p1157_p6 = por (%p282_p2), %p1156_p5, %p1155_p4 }
  0x8f   : > { %369 = vmatprep.subr.mxu1 %v1410_v63  ;;  %858 = vmatpush3.msra.mxu0 %v1332_v24 }
  0x90   : > { %370 = vmatpush1.msra.mxu1 %v1408_v62  ;;  %859 = vmatprep.subr.mxu0 %v1206_v61  ;;  %p1158_p7 = pnand (%p282_p2), %p1157_p6, %p1151_p3 }
  0x91   : > { %371 = vmatprep.subr.mxu1 %v1404_v60  ;;  %860 = vmatpush3.msra.mxu0 %v1330_v23 }
  0x92   : > { %372 = vmatpush1.msra.mxu1 %v1402_v59  ;;  %861 = vmatprep.subr.mxu0 %v1206_v61 }
  0x93   : > { %373 = vmatprep.subr.mxu1 %v1398_v57  ;;  %862 = vmatpush3.msra.mxu0 %v1328_v22 }
  0x94   : > { %374 = vmatpush1.msra.mxu1 %v1396_v56  ;;  %863 = vmatprep.subr.mxu0 %v1206_v61 }
  0x95   : > { %375 = vmatprep.subr.mxu1 %v1392_v54  ;;  %864 = vmatpush3.msra.mxu0 %v1326_v21 }
  0x96   : > { %376 = vmatpush1.msra.mxu1 %v1390_v53  ;;  %865 = vmatprep.subr.mxu0 %v1206_v61 }
  0x97   : > { %377 = vmatprep.subr.mxu1 %v1386_v51  ;;  %866 = vmatpush3.msra.mxu0 %v1324_v20 }
  0x98   : > { %378 = vmatpush1.msra.mxu1 %v1384_v50  ;;  %867 = vmatprep.subr.mxu0 %v1206_v61 }
  0x99   : > { %379 = vmatprep.subr.mxu1 %v1380_v48  ;;  %868 = vmatpush3.msra.mxu0 %v1905_v19 }
  0x9a   : > { %380 = vmatpush1.msra.mxu1 %v1378_v47  ;;  %869 = vmatprep.subr.mxu0 %v1206_v61 }
  0x9b   : > { %381 = vmatprep.subr.mxu1 %v1374_v45  ;;  %870 = vmatpush3.msra.mxu0 %v1906_v18 }
  0x9c   : > { %382 = vmatpush1.msra.mxu1 %v1372_v44  ;;  %871 = vmatprep.subr.mxu0 %v1206_v61 }
  0x9d   : > { %383 = vmatprep.subr.mxu1 %v1368_v42  ;;  %872 = vmatpush3.msra.mxu0 %v1907_v17 }
  0x9e   : > { %384 = vmatpush1.msra.mxu1 %v1366_v41  ;;  %873 = vmatprep.subr.mxu0 %v1206_v61 }
  0x9f   : > { %385 = vmatprep.subr.mxu1 %v1362_v39  ;;  %874 = vmatpush3.msra.mxu0 %v1908_v16 }
  0xa0   : > { %386 = vmatpush1.msra.mxu1 %v1360_v38  ;;  %875 = vmatprep.subr.mxu0 %v1206_v61 }
  0xa1   : > { %387 = vmatprep.subr.mxu1 %v1356_v36  ;;  %876 = vmatpush3.msra.mxu0 %v1909_v15  ;;  %v1984_v15 = vld [vmem:[#allocation22_spill] sm:$0xff] }
  0xa2   : > { %388 = vmatpush1.msra.mxu1 %v1354_v35  ;;  %877 = vmatprep.subr.mxu0 %v1206_v61 }
  0xa3   : > { %389 = vmatprep.subr.mxu1 %v1350_v33  ;;  %878 = vmatpush3.msra.mxu0 %v1910_v14 }
  0xa4   : > { %390 = vmatpush1.msra.mxu1 %v1348_v32  ;;  %879 = vmatprep.subr.mxu0 %v1206_v61 }
  0xa5   : > { %391 = vmatprep.subr.mxu1 %v1344_v30  ;;  %880 = vmatpush3.msra.mxu0 %v1911_v13  ;;  %v1933_v13 = vld [vmem:[#allocation100_spill] sm:$0xff] }
  0xa6   : > { %392 = vmatpush1.msra.mxu1 %v1342_v29  ;;  %882 = vmatmul.mubr.f32.vlgmr.msra.gmra.mxu0 %v289_v1  ;;  %v1914_v1 = vld [vmem:[#allocation47_spill] sm:$0xff] }
  0xa7   : > { %884 = vmatprep.subr.mxu0 %v1206_v61  ;;  %425 = vmatprep.mubr.f32.mxu1 %v1206_v61 }
  0xa8   : > { %885 = vmatpush3.msra.mxu0 %v1436_v31  ;;  %916 = vmatprep.mubr.msk.f32.mxu0 %vm1207_vm0, %v1206_v61 }
  0xa9   : > { %886 = vmatprep.subr.mxu0 %v1206_v61  ;;  %502 = vmatprep.subr.mxu1 %v1530_v40 }
  0xaa   : > { %887 = vmatpush3.msra.mxu0 %v1912_v9 }
  0xab   : > { %888 = vmatprep.subr.mxu0 %v1206_v61 }
  0xac   : > { %889 = vmatpush3.msra.mxu0 %v1913_v12  ;;  %v1931_v12 = vld [vmem:[#allocation98_spill] sm:$0xff] }
  0xad   : > { %890 = vmatprep.subr.mxu0 %v1206_v61 }
  0xae   : > { %891 = vmatpush3.msra.mxu0 %v1914_v1  ;;  %v1920_v1 = vld [vmem:[#allocation39_spill] sm:$0xff] }
  0xaf   : > { %892 = vmatprep.subr.mxu0 %v1206_v61 }
  0xb0   : > { %893 = vmatpush3.msra.mxu0 %v1915_v2  ;;  %v1921_v2 = vld [vmem:[#allocation38_spill] sm:$0xff] }
  0xb1   : > { %894 = vmatprep.subr.mxu0 %v1206_v61 }
  0xb2   : > { %895 = vmatpush3.msra.mxu0 %v1916_v4  ;;  %v1922_v4 = vld [vmem:[#allocation37_spill] sm:$0xff] }
  0xb3   : > { %896 = vmatprep.subr.mxu0 %v1206_v61 }
  0xb4   : > { %897 = vmatpush3.msra.mxu0 %v1917_v6  ;;  %v1923_v6 = vld [vmem:[#allocation36_spill] sm:$0xff] }
  0xb5   : > { %898 = vmatprep.subr.mxu0 %v1206_v61 }
  0xb6   : > { %899 = vmatpush3.msra.mxu0 %v1918_v7  ;;  %v1924_v7 = vld [vmem:[#allocation35_spill] sm:$0xff] }
  0xb7   : > { %900 = vmatprep.subr.mxu0 %v1206_v61 }
  0xb8   : > { %901 = vmatpush3.msra.mxu0 %v1919_v8  ;;  %v1925_v8 = vld [vmem:[#allocation34_spill] sm:$0xff] }
  0xb9   : > { %902 = vmatprep.subr.mxu0 %v1206_v61 }
  0xba   : > { %903 = vmatpush3.msra.mxu0 %v1920_v1  ;;  %v1926_v1 = vld [vmem:[#allocation33_spill] sm:$0xff] }
  0xbb   : > { %904 = vmatprep.subr.mxu0 %v1206_v61 }
  0xbc   : > { %905 = vmatpush3.msra.mxu0 %v1921_v2 }
  0xbd   : > { %906 = vmatprep.subr.mxu0 %v1206_v61 }
  0xbe   : > { %907 = vmatpush3.msra.mxu0 %v1922_v4  ;;  %v1927_v4 = vld [vmem:[#allocation20_spill] sm:$0xff] }
  0xbf   : > { %908 = vmatprep.subr.mxu0 %v1206_v61 }
  0xc0   : > { %909 = vmatpush3.msra.mxu0 %v1923_v6  ;;  %v1928_v6 = vld [vmem:[#allocation101_spill] sm:$0xff] }
  0xc1   : > { %910 = vmatprep.subr.mxu0 %v1206_v61 }
  0xc2   : > { %911 = vmatpush3.msra.mxu0 %v1924_v7  ;;  %v1929_v7 = vld [vmem:[#allocation99_spill] sm:$0xff] }
  0xc3   : > { %912 = vmatprep.subr.mxu0 %v1206_v61 }
  0xc4   : > { %913 = vmatpush3.msra.mxu0 %v1925_v8  ;;  %v1930_v8 = vld [vmem:[#allocation102_spill] sm:$0xff] }
  0xc5   : > { %914 = vmatprep.subr.mxu0 %v1206_v61 }
  0xc6   : > { %915 = vmatpush3.msra.mxu0 %v1926_v1  ;;  %v1932_v1 = vld [vmem:[#allocation96_spill] sm:$0xff] }
  0xc7   : > { %919 = vmatprep.subr.mxu0 %v1206_v61 }
 0x166   : > { %v356_v2 = vpop.f32.mrf.mxu0 }
 0x167   : > { %v357_v9 = vadd.f32 %v1927_v4, %v356_v2  ;;  %v1937_v2 = vld [vmem:[#allocation92_spill] sm:$0xff]  ;;  %v1938_v4 = vld [vmem:[#allocation90_spill] sm:$0xff] }
 0x168   : > { %v883_v10 = vpop.f32.mrf.mxu0 }
 0x169   : > { %v360_v11 = vmax.f32 %v357_v9, 0.0  ;;  %v1934_v10 = vld [vmem:[#allocation95_spill] sm:$0xff]  ;;  %v1935_v9 = vld [vmem:[#allocation93_spill] sm:$0xff] }
 0x16b   : > { %426 = vmatmul.mubr.f32.vlgmr.msra.gmra.mxu1 %v360_v11  ;;  %917 = vmatmul.mubr.f32.vlgmr.msra.gmra.mxu0 %v360_v11  ;;  %v1936_v11 = vld [vmem:[#allocation97_spill] sm:$0xff] }
 0x16c   : > { %503 = vmatpush1.msra.mxu1 %v1928_v6  ;;  %566 = vmatprep.mubr.f32.mxu1 %v1206_v61  ;;  %v1940_v6 = vld [vmem:[#allocation89_spill] sm:$0xff] }
 0x16d   : > { %504 = vmatprep.subr.mxu1 %v1929_v7  ;;  %920 = vmatpush3.msra.mxu0 %v1930_v8  ;;  %v1942_v7 = vld [vmem:[#allocation91_spill] sm:$0xff]  ;;  %v1943_v8 = vld [vmem:[#allocation86_spill] sm:$0xff] }
 0x16e   : > { %505 = vmatpush1.msra.mxu1 %v1931_v12  ;;  %921 = vmatprep.subr.mxu0 %v1206_v61  ;;  %v1939_v12 = vld [vmem:[#allocation94_spill] sm:$0xff] }
 0x16f   : > { %506 = vmatprep.subr.mxu1 %v1932_v1  ;;  %922 = vmatpush3.msra.mxu0 %v1933_v13  ;;  %v1941_v13 = vld [vmem:[#allocation87_spill] sm:$0xff]  ;;  %v1944_v1 = vld [vmem:[#allocation84_spill] sm:$0xff] }
 0x170   : > { %507 = vmatpush1.msra.mxu1 %v1934_v10  ;;  %923 = vmatprep.subr.mxu0 %v1206_v61  ;;  %v1945_v10 = vld [vmem:[#allocation88_spill] sm:$0xff] }
 0x171   : > { %508 = vmatprep.subr.mxu1 %v1935_v9  ;;  %924 = vmatpush3.msra.mxu0 %v1936_v11  ;;  %v1946_v9 = vld [vmem:[#allocation83_spill] sm:$0xff]  ;;  %v1947_v11 = vld [vmem:[#allocation81_spill] sm:$0xff] }
 0x172   : > { %509 = vmatpush1.msra.mxu1 %v1937_v2  ;;  %925 = vmatprep.subr.mxu0 %v1206_v61  ;;  %v1948_v2 = vld [vmem:[#allocation85_spill] sm:$0xff] }
 0x173   : > { %510 = vmatprep.subr.mxu1 %v1938_v4  ;;  %926 = vmatpush3.msra.mxu0 %v1939_v12  ;;  %v1949_v4 = vld [vmem:[#allocation80_spill] sm:$0xff]  ;;  %v1950_v12 = vld [vmem:[#allocation78_spill] sm:$0xff] }
 0x174   : > { %511 = vmatpush1.msra.mxu1 %v1940_v6  ;;  %927 = vmatprep.subr.mxu0 %v1206_v61  ;;  %v1951_v6 = vld [vmem:[#allocation82_spill] sm:$0xff] }
 0x175   : > { %512 = vmatprep.subr.mxu1 %v1941_v13  ;;  %928 = vmatpush3.msra.mxu0 %v1942_v7  ;;  %v1952_v13 = vld [vmem:[#allocation77_spill] sm:$0xff]  ;;  %v1953_v7 = vld [vmem:[#allocation75_spill] sm:$0xff] }
 0x176   : > { %513 = vmatpush1.msra.mxu1 %v1943_v8  ;;  %929 = vmatprep.subr.mxu0 %v1206_v61  ;;  %v1954_v8 = vld [vmem:[#allocation79_spill] sm:$0xff] }
 0x177   : > { %514 = vmatprep.subr.mxu1 %v1944_v1  ;;  %930 = vmatpush3.msra.mxu0 %v1945_v10  ;;  %v1955_v1 = vld [vmem:[#allocation74_spill] sm:$0xff]  ;;  %v1956_v10 = vld [vmem:[#allocation72_spill] sm:$0xff] }
 0x178   : > { %515 = vmatpush1.msra.mxu1 %v1946_v9  ;;  %931 = vmatprep.subr.mxu0 %v1206_v61  ;;  %v1957_v9 = vld [vmem:[#allocation76_spill] sm:$0xff] }
 0x179   : > { %516 = vmatprep.subr.mxu1 %v1947_v11  ;;  %932 = vmatpush3.msra.mxu0 %v1948_v2  ;;  %v1958_v11 = vld [vmem:[#allocation71_spill] sm:$0xff]  ;;  %v1959_v2 = vld [vmem:[#allocation69_spill] sm:$0xff] }
 0x17a   : > { %517 = vmatpush1.msra.mxu1 %v1949_v4  ;;  %933 = vmatprep.subr.mxu0 %v1206_v61  ;;  %v1960_v4 = vld [vmem:[#allocation73_spill] sm:$0xff] }
 0x17b   : > { %518 = vmatprep.subr.mxu1 %v1950_v12  ;;  %934 = vmatpush3.msra.mxu0 %v1951_v6  ;;  %v1961_v12 = vld [vmem:[#allocation68_spill] sm:$0xff]  ;;  %v1962_v6 = vld [vmem:[#allocation66_spill] sm:$0xff] }
 0x17c   : > { %519 = vmatpush1.msra.mxu1 %v1952_v13  ;;  %935 = vmatprep.subr.mxu0 %v1206_v61  ;;  %v1963_v13 = vld [vmem:[#allocation70_spill] sm:$0xff] }
 0x17d   : > { %520 = vmatprep.subr.mxu1 %v1953_v7  ;;  %936 = vmatpush3.msra.mxu0 %v1954_v8  ;;  %v1964_v7 = vld [vmem:[#allocation65_spill] sm:$0xff]  ;;  %v1965_v8 = vld [vmem:[#allocation63_spill] sm:$0xff] }
 0x17e   : > { %521 = vmatpush1.msra.mxu1 %v1955_v1  ;;  %937 = vmatprep.subr.mxu0 %v1206_v61  ;;  %v1966_v1 = vld [vmem:[#allocation67_spill] sm:$0xff] }
 0x17f   : > { %522 = vmatprep.subr.mxu1 %v1956_v10  ;;  %938 = vmatpush3.msra.mxu0 %v1957_v9  ;;  %v1967_v10 = vld [vmem:[#allocation62_spill] sm:$0xff]  ;;  %v1968_v9 = vld [vmem:[#allocation60_spill] sm:$0xff] }
 0x180   : > { %523 = vmatpush1.msra.mxu1 %v1958_v11  ;;  %939 = vmatprep.subr.mxu0 %v1206_v61  ;;  %v1969_v11 = vld [vmem:[#allocation64_spill] sm:$0xff] }
 0x181   : > { %524 = vmatprep.subr.mxu1 %v1959_v2  ;;  %940 = vmatpush3.msra.mxu0 %v1960_v4  ;;  %v1970_v2 = vld [vmem:[#allocation59_spill] sm:$0xff]  ;;  %v1971_v4 = vld [vmem:[#allocation57_spill] sm:$0xff] }
 0x182   : > { %525 = vmatpush1.msra.mxu1 %v1961_v12  ;;  %941 = vmatprep.subr.mxu0 %v1206_v61  ;;  %v1972_v12 = vld [vmem:[#allocation61_spill] sm:$0xff] }
 0x183   : > { %526 = vmatprep.subr.mxu1 %v1962_v6  ;;  %942 = vmatpush3.msra.mxu0 %v1963_v13  ;;  %v1973_v6 = vld [vmem:[#allocation56_spill] sm:$0xff]  ;;  %v1974_v13 = vld [vmem:[#allocation58_spill] sm:$0xff] }
 0x184   : > { %527 = vmatpush1.msra.mxu1 %v1964_v7  ;;  %943 = vmatprep.subr.mxu0 %v1206_v61  ;;  %v1977_v7 = vld [vmem:[#allocation108_spill] sm:$0xff] }
 0x185   : > { %528 = vmatprep.subr.mxu1 %v1965_v8  ;;  %944 = vmatpush3.msra.mxu0 %v1966_v1  ;;  %v1978_v8 = vld [vmem:[#allocation107_spill] sm:$0xff]  ;;  %v1979_v1 = vld [vmem:[#allocation106_spill] sm:$0xff] }
 0x186   : > { %529 = vmatpush1.msra.mxu1 %v1967_v10  ;;  %945 = vmatprep.subr.mxu0 %v1206_v61  ;;  %v1980_v10 = vld [vmem:[#allocation105_spill] sm:$0xff] }
 0x187   : > { %530 = vmatprep.subr.mxu1 %v1968_v9  ;;  %946 = vmatpush3.msra.mxu0 %v1969_v11  ;;  %v1981_v9 = vld [vmem:[#allocation104_spill] sm:$0xff]  ;;  %v1982_v11 = vld [vmem:[#allocation103_spill] sm:$0xff] }
 0x188   : > { %531 = vmatpush1.msra.mxu1 %v1970_v2  ;;  %947 = vmatprep.subr.mxu0 %v1206_v61 }
 0x189   : > { %532 = vmatprep.subr.mxu1 %v1971_v4  ;;  %948 = vmatpush3.msra.mxu0 %v1972_v12 }
 0x18a   : > { %533 = vmatpush1.msra.mxu1 %v1973_v6  ;;  %949 = vmatprep.subr.mxu0 %v1206_v61 }
 0x18b   : > { %567 = vmatmul.mubr.f32.vlgmr.msra.gmra.mxu1 %v1190_v5  ;;  %950 = vmatpush3.msra.mxu0 %v1974_v13  ;;  %v1983_v13 = vld [vmem:[#allocation21_spill] sm:$0xff] }
 0x18c   : > { %951 = vmatprep.mubr.msk.f32.mxu0 %vm1207_vm0, %v1206_v61  ;;  %954 = vmatprep.subr.mxu1 %v1206_v61 }
 0x18d   : > { %952 = vmatmul.mubr.f32.vlgmr.msra.gmra.mxu0 %v1190_v5  ;;  %955 = vmatpush3.msra.mxu1 %v1564_v58 }
 0x18e   : > { %956 = vmatprep.subr.mxu1 %v1206_v61  ;;  %986 = vmatprep.mubr.msk.f32.mxu1 %vm1207_vm0, %v1206_v61 }
 0x18f   : > { %957 = vmatpush3.msra.mxu1 %v1562_v55 }
 0x190   : > { %958 = vmatprep.subr.mxu1 %v1206_v61 }
 0x191   : > { %959 = vmatpush3.msra.mxu1 %v1560_v52 }
 0x192   : > { %960 = vmatprep.subr.mxu1 %v1206_v61 }
 0x193   : > { %961 = vmatpush3.msra.mxu1 %v1558_v49 }
 0x194   : > { %962 = vmatprep.subr.mxu1 %v1206_v61 }
 0x195   : > { %963 = vmatpush3.msra.mxu1 %v1556_v46 }
 0x196   : > { %964 = vmatprep.subr.mxu1 %v1206_v61 }
 0x197   : > { %965 = vmatpush3.msra.mxu1 %v1554_v43 }
 0x198   : > { %966 = vmatprep.subr.mxu1 %v1206_v61 }
 0x199   : > { %967 = vmatpush3.msra.mxu1 %v1975_v3 }
 0x19a   : > { %968 = vmatprep.subr.mxu1 %v1206_v61 }
 0x19b   : > { %969 = vmatpush3.msra.mxu1 %v1550_v37 }
 0x19c   : > { %970 = vmatprep.subr.mxu1 %v1206_v61 }
 0x19d   : > { %971 = vmatpush3.msra.mxu1 %v1548_v34 }
 0x19e   : > { %972 = vmatprep.subr.mxu1 %v1206_v61 }
 0x19f   : > { %973 = vmatpush3.msra.mxu1 %v1976_v0 }
 0x1a0   : > { %974 = vmatprep.subr.mxu1 %v1206_v61 }
 0x1a1   : > { %975 = vmatpush3.msra.mxu1 %v1977_v7 }
 0x1a2   : > { %976 = vmatprep.subr.mxu1 %v1206_v61 }
 0x1a3   : > { %977 = vmatpush3.msra.mxu1 %v1978_v8 }
 0x1a4   : > { %978 = vmatprep.subr.mxu1 %v1206_v61 }
 0x1a5   : > { %979 = vmatpush3.msra.mxu1 %v1979_v1 }
 0x1a6   : > { %980 = vmatprep.subr.mxu1 %v1206_v61 }
 0x1a7   : > { %981 = vmatpush3.msra.mxu1 %v1980_v10 }
 0x1a8   : > { %982 = vmatprep.subr.mxu1 %v1206_v61 }
 0x1a9   : > { %983 = vmatpush3.msra.mxu1 %v1981_v9 }
 0x1aa   : > { %984 = vmatprep.subr.mxu1 %v1206_v61 }
 0x1ab   : > { %985 = vmatpush3.msra.mxu1 %v1982_v11 }
 0x22b   : > { %v498_v2 = vpop.f32.mrf.mxu0  ;;  %v427_v12 = vpop.f32.mrf.mxu1 }
 0x22c   : > { %v428_v7 = vadd.f32 %v427_v12, %v1983_v13  ;;  %v1986_v13 = vld [vmem:[#allocation23_spill] sm:$0xff] }
 0x22d   : > { %v918_v4 = vpop.f32.mrf.mxu0  ;;  %v429_v6 = vpop.f32.mrf.mxu1 }
 0x22e   : > { %v430_v16 = vadd.f32 %v429_v6, %v1984_v15  ;;  %v1985_v4 = vld [vmem:[#allocation24_spill] sm:$0xff] }
 0x24b   : > { %v568_v8 = vpop.f32.mrf.mxu1 }
 0x24c   : > { %v643_v1 = vadd.f32 %v568_v8, %v428_v7  ;;  %v499_v7 = vadd.f32 %v498_v2, %v1986_v13 }
 0x24d   : > { %v639_v0 = vpop.f32.mrf.mxu0  ;;  %v570_v10 = vpop.f32.mrf.mxu1 }
 0x24e   : > { %v776_v3 = vmul.f32 -1.442695, %v643_v1  ;;  %v650_v9 = vadd.f32 %v570_v10, %v430_v16  ;;  %v657_v18 = vadd.f32 %v1985_v4, %v639_v0  ;;  %v1987_v0 = vld [vmem:[#allocation25_spill] sm:$0xff] }
 0x24f   : > { %v953_v14 = vpop.f32.mrf.mxu0 }
 0x250   : > { %1020 = vpow2.f32 %v776_v3  ;;  %v777_v17 = vmul.f32 -1.442695, %v650_v9 }
 0x252   : > { %1022 = vpow2.f32 %v777_v17 }
 0x25d   : > { %v1021_v61 = vpop.eup %1020 }
 0x25e   : > { %v647_v11 = vadd.f32 1.0, %v1021_v61 }
 0x25f   : > { %v1023_v19 = vpop.eup %1022 }
 0x260   : > { %1024 = vrcp.f32 %v647_v11  ;;  %v654_v1 = vadd.f32 1.0, %v1023_v19 }
 0x26d   : > { %v1025_v12 = vpop.eup %1024 }
 0x26e   : > { %v658_v8 = vmul.f32 %v1025_v12, %v657_v18 }
 0x270   : > { %v659_v14 = vadd.f32 %v658_v8, %v499_v7 }
 0x272   : > { %1026 = vtanh.f32 %v659_v14 }
 0x273   : > { %1028 = vrcp.f32 %v654_v1 }
 0x27f   : > { %v1027_v3 = vpop.eup %1026 }
 0x280   : > { %v661_v15 = vsub.f32 %v1190_v5, %v1027_v3  ;;  %v1029_v16 = vpop.eup %1028 }
 0x282   : > { %v662_v6 = vmul.f32 %v1029_v16, %v661_v15 }
 0x284   : > { %v663_v5 = vadd.f32 %v1027_v3, %v662_v6  }
 0x286   : > { %987 = vmatmul.mubr.f32.vlgmr.msra.gmra.mxu1 %v663_v5  ;;  %737 = vst [vmem:[%s736_s16] sm:$0xff] %v663_v5 }
 0x345   :  { %284 = sbr.rel (!%p282_p2) target bundleno = 133 (0x85), region = 85 }
 0x346   : > { %v730_v17 = vpop.f32.mrf.mxu1 }
 0x347   : > { %v731_v10 = vadd.f32 %v1987_v0, %v730_v17 }
 0x348   : > { %v988_v9 = vpop.f32.mrf.mxu1 }
 0x349   : > { %738 = vst [vmem:[%s736_s16 + $0x8] sm:$0xff] %v731_v10 }
 0x34a   :  { %1161 = shalt.err (!%p1158_p7)
}
 0x34b   :  { %s1209_s19 = smov 256   ;;  %s1210_s20 = smov 16  }
 0x34c   :  { %751 = dma.vmem_to_hbm [thread:$0]  %s746_s18, 2048, %s1805_s7, [#allocation5], %s1209_s19, %s1209_s19, %s1210_s20  }
 0x34d   :  { %1186 = dma.done.wait [#allocation5], 2048  }
 0x34e   :  { %1187 = vsyncadd [#allocation5], 4294965248 }
 0x34f   :  { %755 = vsyncpa [#allocation4], 1 }
 0x350   :  { %756 = vsyncpa [#allocation7], 1 }
 0x351   :  { %757 = vsyncpa [#allocation10], 1 }
 0x352   :  { %758 = vsyncpa [#allocation13], 1 }
 0x353   :  { %759 = vsyncpa [#allocation5], 1 }

</bundles_post_ra>
